<compile_context>
chip_gen: v5e
topology: v5e:2x2
jax: 0.10.0
libtpu: 0.0.40
codegen_flags: <defaults>
</compile_context>

<pallas_src>
import functools

import jax
import jax.numpy as jnp
from jax.experimental import pallas as pl
from jax.experimental.pallas import tpu as pltpu

H1, H2 = 250, 125          # torch hidden sizes
H1_PAD, H2_PAD = 256, 128  # MXU / lane aligned
LANE = 128


def _round_up(n, m):
    return ((n + m - 1) // m) * m


# --------------------------------------------------------------------------- #
# Kernel                                                                      #
# --------------------------------------------------------------------------- #
def _mlp_kernel(x_ref, w1_ref, b1_ref, w2_ref, w3_ref, o_ref, *, apply_sigmoid):
    """One batch tile: (Linear->ReLU)x2 on the MXU, fc3 as a VPU lane reduction.

    Bias handling: b1 is a real f32 broadcast add; b2 rides the constant-1
    h1 lane (index 250) folded into w2; b3 rides the constant-1 h2 lane
    (index 125) folded into w3.  Padded lanes stay exactly zero.
    """
    # In-kernel bf16 cast (VPU filler under the MXU) instead of a wrapper pass.
    x = x_ref[...].astype(jnp.bfloat16)                         # (TB, F)

    # fc1 + bias + ReLU  (bf16 MXU matmul, f32 accumulate / bias / ReLU).
    h1 = jnp.dot(x, w1_ref[...], preferred_element_type=jnp.float32)
    h1 = jnp.maximum(h1 + b1_ref[...], 0.0)                     # (TB, 256) f32

    # fc2 + ReLU; b2 already folded into w2 via the constant-1 h1 lane.
    h2 = jnp.dot(h1.astype(jnp.bfloat16), w2_ref[...],
                 preferred_element_type=jnp.float32)
    h2 = jnp.maximum(h2, 0.0)                                   # (TB, 128) f32

    # fc3 (single output column): VPU multiply + lane reduction against the
    # (1, 128) w3 row (b3 folded into its lane 125).  Padded lanes are zero.
    logit = jnp.sum(h2 * w3_ref[...], axis=-1)                  # (TB,) f32

    if apply_sigmoid:
        logit = jax.nn.sigmoid(logit)

    # Lane-dense store: batch sits on the lane axis of a (1, 1, TB) row.
    o_ref[...] = logit[None, None, :].astype(o_ref.dtype)


# --------------------------------------------------------------------------- #
# Tiling / VMEM budget                                                        #
# --------------------------------------------------------------------------- #
def _vmem_budget_bytes():
    """Generation-aware VMEM budget: ~48 MiB on v7x (64 MiB), ~96 MiB on v5e/v6e."""
    try:
        cap = pltpu.get_tpu_info().vmem_capacity_bytes
    except Exception:
        cap = 64 * 1024 * 1024          # conservative fallback (safe on v7x)
    return max(16 * 1024 * 1024, min((cap * 3) // 4, 96 * 1024 * 1024))


def _pick_batch_tiling(batch, num_features, vmem_budget):
    """Pick (tb, nb) so resident weights + x double buffer + intermediates fit."""
    # Resident, single-buffered weights (constant index_map, pl.Buffered(1)).
    resident = (num_features * H1_PAD * 2      # w1 bf16
                + H1_PAD * H2_PAD * 2          # w2 bf16
                + H1_PAD * 4 + H2_PAD * 4)     # b1, w3 f32
    headroom = 4 * 1024 * 1024                 # Mosaic internal scratch etc.
    # Bytes that scale with the batch tile.
    per_row = (2 * num_features * 4            # double-buffered f32 x tile
               + 2 * 4                         # double-buffered f32 output row
               + H1_PAD * 4 + H1_PAD * 2       # h1 f32 + bf16 copy
               + 2 * H2_PAD * 4)               # h2 f32 + h2*w3 product
    avail = vmem_budget - resident - headroom
    # TODO(synk): if w1 no longer fits VMEM-resident (f_pad >~ 16-32K on v7x's
    # 64 MiB), add an "arbitrary" K grid axis with an f32 accumulator scratch
    # and stream w1 instead of keeping it resident.
    tb_cap = max(8, min(4096, avail // per_row if avail > 0 else 8))

    nb = pl.cdiv(batch, tb_cap)
    if batch > 256:
        nb = max(nb, 2)                        # v7x: keep both TensorCores busy
    tb = _round_up(pl.cdiv(batch, nb), 8)      # balanced, 8-aligned tiles
    nb = pl.cdiv(batch, tb)
    return tb, nb


# --------------------------------------------------------------------------- #
# One-time parameter preparation (pad, fold biases, cast) — hoisted from the  #
# per-call forward.                                                           #
# --------------------------------------------------------------------------- #
def prepare_params(params):
    w1 = jnp.asarray(params["w1"], jnp.float32)              # (F, 250)
    b1 = jnp.asarray(params["b1"], jnp.float32).reshape(-1)  # (250,)
    w2 = jnp.asarray(params["w2"], jnp.float32)              # (250, 125)
    b2 = jnp.asarray(params["b2"], jnp.float32).reshape(-1)  # (125,)
    w3 = jnp.asarray(params["w3"], jnp.float32).reshape(-1)  # (125,)
    b3 = jnp.asarray(params["b3"], jnp.float32).reshape(())  # ()
    num_features = w1.shape[0]

    w1p = jnp.zeros((num_features, H1_PAD), jnp.float32).at[:, :H1].set(w1)
    # b1 stays a real f32 add; padded lane 250 becomes the constant-1 carrier.
    b1p = (jnp.zeros((1, H1_PAD), jnp.float32)
           .at[0, :H1].set(b1)
           .at[0, H1].set(1.0))
    # Fold b2 onto the constant-1 h1 lane; make h2 lane 125 the constant-1
    # carrier for b3.
    w2p = (jnp.zeros((H1_PAD, H2_PAD), jnp.float32)
           .at[:H1, :H2].set(w2)
           .at[H1, :H2].set(b2)
           .at[H1, H2].set(1.0))
    # Fold b3 onto the constant-1 h2 lane.
    w3p = (jnp.zeros((1, H2_PAD), jnp.float32)
           .at[0, :H2].set(w3)
           .at[0, H2].set(b3))

    return {
        "num_features": num_features,
        "w1": w1p.astype(jnp.bfloat16),   # (F, 256) bf16, VMEM-resident
        "b1": b1p,                        # (1, 256) f32
        "w2": w2p.astype(jnp.bfloat16),   # (256, 128) bf16
        "w3": w3p,                        # (1, 128) f32
    }


# --------------------------------------------------------------------------- #
# Forward                                                                     #
# --------------------------------------------------------------------------- #
def review_classifier_forward(x, prepared, apply_sigmoid=False):
    """Fused MLP forward. x: (batch, num_features) f32 -> (batch,) f32."""
    batch, num_features = x.shape
    assert num_features == prepared["num_features"]

    vmem_budget = _vmem_budget_bytes()
    tb, nb = _pick_batch_tiling(batch, num_features, vmem_budget)

    w1, b1, w2, w3 = prepared["w1"], prepared["b1"], prepared["w2"], prepared["w3"]
    kernel = functools.partial(_mlp_kernel, apply_sigmoid=apply_sigmoid)

    rows = nb * tb
    flops = 2 * rows * (num_features * H1_PAD + H1_PAD * H2_PAD + H2_PAD)
    bytes_accessed = (batch * num_features * 4
                      + w1.size * 2 + w2.size * 2 + (b1.size + w3.size) * 4
                      + rows * 4)

    resident_spec = dict(pipeline_mode=pl.Buffered(1))  # constant index_map -> 1 buffer

    out = pl.pallas_call(
        kernel,
        out_shape=jax.ShapeDtypeStruct((nb, 1, tb), jnp.float32),
        grid=(nb,),
        in_specs=[
            # x streamed per batch tile, f32, unpadded feature dim.
            pl.BlockSpec((tb, num_features), lambda i: (i, 0)),
            # Weights: VMEM-resident, single-buffered.
            pl.BlockSpec((num_features, H1_PAD), lambda i: (0, 0), **resident_spec),
            pl.BlockSpec((1, H1_PAD), lambda i: (0, 0), **resident_spec),
            pl.BlockSpec((H1_PAD, H2_PAD), lambda i: (0, 0), **resident_spec),
            pl.BlockSpec((1, H2_PAD), lambda i: (0, 0), **resident_spec),
        ],
        out_specs=pl.BlockSpec((1, 1, tb), lambda i: (i, 0, 0)),  # lane-dense rows
        compiler_params=pltpu.CompilerParams(
            dimension_semantics=("parallel",),
            vmem_limit_bytes=int(vmem_budget),
        ),
        cost_estimate=pl.CostEstimate(
            flops=flops,
            transcendentals=rows if apply_sigmoid else 0,
            bytes_accessed=bytes_accessed,
        ),
    )(x, w1, b1, w2, w3)

    # Rows >= batch (partial last block / 8-alignment) are garbage by
    # construction and must be dropped; torch does .squeeze() -> (batch,).
    return out.reshape(-1)[:batch]


# --------------------------------------------------------------------------- #
# Init + pure-JAX reference                                                   #
# --------------------------------------------------------------------------- #
def init_params(key, num_features):
    """Deterministic init mimicking torch.nn.Linear defaults (U(-1/sqrt(fan_in), +))."""
    def linear_init(k, fan_in, fan_out):
        kw, kb = jax.random.split(k)
        bound = 1.0 / jnp.sqrt(fan_in)
        w = jax.random.uniform(kw, (fan_in, fan_out), jnp.float32, -bound, bound)
        b = jax.random.uniform(kb, (fan_out,), jnp.float32, -bound, bound)
        return w, b

    k1, k2, k3 = jax.random.split(key, 3)
    w1, b1 = linear_init(k1, num_features, H1)
    w2, b2 = linear_init(k2, H1, H2)
    w3, b3 = linear_init(k3, H2, 1)
    return {"w1": w1, "b1": b1, "w2": w2, "b2": b2,
            "w3": w3.reshape(H2, 1), "b3": b3}


def reference_forward(x, params, apply_sigmoid=False):
    """Full-f32 reference matching the PyTorch module semantics exactly."""
    hi = jax.lax.Precision.HIGHEST
    h1 = jnp.maximum(jnp.dot(x, params["w1"], precision=hi)
                     + params["b1"][None, :], 0.0)
    h2 = jnp.maximum(jnp.dot(h1, params["w2"], precision=hi)
                     + params["b2"][None, :], 0.0)
    out = (jnp.dot(h2, params["w3"], precision=hi)
           + params["b3"][None, :]).reshape(-1)
    if apply_sigmoid:
        out = jax.nn.sigmoid(out)
    return out


if __name__ == "__main__":
    key = jax.random.PRNGKey(0)
    k_params, k_x = jax.random.split(key)

    batch = 8
    num_features = 32

    params = init_params(k_params, num_features)
    prepared = prepare_params(params)          # one-time pad / fold / cast
    x = jax.random.normal(k_x, (batch, num_features), jnp.float32)

    # Default path (logits) — matches nn.Module default forward.
    logits = review_classifier_forward(x, prepared, apply_sigmoid=False)
    jax.block_until_ready(logits)

    # Sigmoid branch.
    probs = review_classifier_forward(x, prepared, apply_sigmoid=True)
    jax.block_until_ready(probs)

    # Validate against a full-f32 reference; tolerance reflects bf16 x/w1/w2
    # (and bf16-folded b2) inside the kernel.
    ref_logits = reference_forward(x, params, apply_sigmoid=False)
    ref_probs = reference_forward(x, params, apply_sigmoid=True)
    assert logits.shape == (batch,)
    assert probs.shape == (batch,)
    assert jnp.allclose(logits, ref_logits, atol=2e-2, rtol=2e-2), (
        float(jnp.max(jnp.abs(logits - ref_logits))))
    assert jnp.allclose(probs, ref_probs, atol=2e-2, rtol=2e-2), (
        float(jnp.max(jnp.abs(probs - ref_probs))))

    print("KERNEL_OK")
</pallas_src>

<mosaic_0001>
module attributes {stable_mosaic.version = 11 : i64} {
  func.func @_mlp_kernel(%arg0: i32, %arg1: memref<8x32xf32, #tpu.memory_space<vmem>>, %arg2: memref<32x256xbf16, #tpu.memory_space<vmem>>, %arg3: memref<1x256xf32, #tpu.memory_space<vmem>>, %arg4: memref<256x128xbf16, #tpu.memory_space<vmem>>, %arg5: memref<1x128xf32, #tpu.memory_space<vmem>>, %arg6: memref<1x1x8xf32, #tpu.memory_space<vmem>>) attributes {dimension_semantics = [#tpu.dimension_semantics<parallel>], iteration_bounds = array<i64: 1>, scalar_prefetch = 0 : i64, scratch_operands = 0 : i64, tpu.core_type = #tpu.core_type<tc>, window_params = [{transform_indices = @transform_0, window_bounds = array<i64: 8, 32>}, {pipeline_mode = #tpu.pipeline_mode<synchronous>, transform_indices = @transform_1, window_bounds = array<i64: 32, 256>}, {pipeline_mode = #tpu.pipeline_mode<synchronous>, transform_indices = @transform_2, window_bounds = array<i64: 1, 256>}, {pipeline_mode = #tpu.pipeline_mode<synchronous>, transform_indices = @transform_3, window_bounds = array<i64: 256, 128>}, {pipeline_mode = #tpu.pipeline_mode<synchronous>, transform_indices = @transform_4, window_bounds = array<i64: 1, 128>}, {transform_indices = @transform_5, window_bounds = array<i64: 1, 1, 8>}]} {
    %c0 = arith.constant 0 : index
    %c0_0 = arith.constant 0 : index
    %0 = vector.load %arg1[%c0, %c0_0] : memref<8x32xf32, #tpu.memory_space<vmem>>, vector<8x32xf32>
    %1 = arith.truncf %0 : vector<8x32xf32> to vector<8x32xbf16>
    %c0_1 = arith.constant 0 : index
    %c0_2 = arith.constant 0 : index
    %2 = vector.load %arg2[%c0_1, %c0_2] : memref<32x256xbf16, #tpu.memory_space<vmem>>, vector<32x256xbf16>
    %cst = arith.constant dense<0.000000e+00> : vector<8x256xf32>
    %3 = tpu.matmul %1, %2, %cst {dimension_numbers = #tpu.dot_dimension_numbers<[1], [0], [0], [1], [0, 0, 1, 1], [], []>} : vector<8x32xbf16>, vector<32x256xbf16>, vector<8x256xf32> -> vector<8x256xf32>
    %c0_3 = arith.constant 0 : index
    %c0_4 = arith.constant 0 : index
    %4 = vector.load %arg3[%c0_3, %c0_4] : memref<1x256xf32, #tpu.memory_space<vmem>>, vector<1x256xf32>
    %5 = vector.broadcast %4 : vector<1x256xf32> to vector<8x256xf32>
    %6 = arith.addf %3, %5 : vector<8x256xf32>
    %cst_5 = arith.constant 0.000000e+00 : f32
    %7 = vector.broadcast %cst_5 : f32 to vector<8x256xf32>
    %8 = arith.maximumf %6, %7 : vector<8x256xf32>
    %9 = arith.truncf %8 : vector<8x256xf32> to vector<8x256xbf16>
    %c0_6 = arith.constant 0 : index
    %c0_7 = arith.constant 0 : index
    %10 = vector.load %arg4[%c0_6, %c0_7] : memref<256x128xbf16, #tpu.memory_space<vmem>>, vector<256x128xbf16>
    %cst_8 = arith.constant dense<0.000000e+00> : vector<8x128xf32>
    %11 = tpu.matmul %9, %10, %cst_8 {dimension_numbers = #tpu.dot_dimension_numbers<[1], [0], [0], [1], [0, 0, 1, 1], [], []>} : vector<8x256xbf16>, vector<256x128xbf16>, vector<8x128xf32> -> vector<8x128xf32>
    %cst_9 = arith.constant 0.000000e+00 : f32
    %12 = vector.broadcast %cst_9 : f32 to vector<8x128xf32>
    %13 = arith.maximumf %11, %12 : vector<8x128xf32>
    %c0_10 = arith.constant 0 : index
    %c0_11 = arith.constant 0 : index
    %14 = vector.load %arg5[%c0_10, %c0_11] : memref<1x128xf32, #tpu.memory_space<vmem>>, vector<1x128xf32>
    %15 = vector.broadcast %14 : vector<1x128xf32> to vector<8x128xf32>
    %16 = arith.mulf %13, %15 : vector<8x128xf32>
    %cst_12 = arith.constant dense<0.000000e+00> : vector<8xf32>
    %17 = vector.multi_reduction <add>, %16, %cst_12 [1] : vector<8x128xf32> to vector<8xf32>
    %18 = vector.shape_cast %17 : vector<8xf32> to vector<1x1x8xf32>
    %c0_13 = arith.constant 0 : index
    %c0_14 = arith.constant 0 : index
    %c0_15 = arith.constant 0 : index
    %19 = vector.load %arg6[%c0_13, %c0_14, %c0_15] : memref<1x1x8xf32, #tpu.memory_space<vmem>>, vector<1x1x8xf32>
    tpu.vector_store %arg6[%c0_13, %c0_14, %c0_15], %18 {strides = array<i32>} : memref<1x1x8xf32, #tpu.memory_space<vmem>>, vector<1x1x8xf32>,
    return
  }
  func.func @transform_0(%arg0: i32) -> (i32, i32) {
    %c0_i32 = arith.constant 0 : i32
    %c0_i32_0 = arith.constant 0 : i32
    return %arg0, %c0_i32 : i32, i32
  }
  func.func @transform_1(%arg0: i32) -> (i32, i32) {
    %c0_i32 = arith.constant 0 : i32
    %c0_i32_0 = arith.constant 0 : i32
    %c0_i32_1 = arith.constant 0 : i32
    return %c0_i32, %c0_i32_0 : i32, i32
  }
  func.func @transform_2(%arg0: i32) -> (i32, i32) {
    %c0_i32 = arith.constant 0 : i32
    %c0_i32_0 = arith.constant 0 : i32
    %c0_i32_1 = arith.constant 0 : i32
    return %c0_i32, %c0_i32_0 : i32, i32
  }
  func.func @transform_3(%arg0: i32) -> (i32, i32) {
    %c0_i32 = arith.constant 0 : i32
    %c0_i32_0 = arith.constant 0 : i32
    %c0_i32_1 = arith.constant 0 : i32
    return %c0_i32, %c0_i32_0 : i32, i32
  }
  func.func @transform_4(%arg0: i32) -> (i32, i32) {
    %c0_i32 = arith.constant 0 : i32
    %c0_i32_0 = arith.constant 0 : i32
    %c0_i32_1 = arith.constant 0 : i32
    return %c0_i32, %c0_i32_0 : i32, i32
  }
  func.func @transform_5(%arg0: i32) -> (i32, i32, i32) {
    %c0_i32 = arith.constant 0 : i32
    %c0_i32_0 = arith.constant 0 : i32
    %c0_i32_1 = arith.constant 0 : i32
    return %arg0, %c0_i32, %c0_i32_0 : i32, i32, i32
  }
}

</mosaic_0001>

<bundles_post_ra>
// kernel: tpu_custom_call.1
= control target key start
LH: loop header
LB: loop body
LE: loop exit
PB: predicated region body
PF: predicated region fallthrough
CT: control target
= control target key end

     0   :  { %10 = vsyncpa [#allocation3], 0  ;;  %s632_s0 = inlined_call_operand.hbm [shape: f32[8,32], index: 0, kind: input, shape index: {}]   ;;  %s633_s1 = inlined_call_operand.hbm [shape: bf16[32,256], index: 1, kind: input, shape index: {}]   ;;  %s634_s2 = inlined_call_operand.hbm [shape: f32[1,256], index: 2, kind: input, shape index: {}]   ;;  %s635_s3 = inlined_call_operand.hbm [shape: bf16[256,128], index: 3, kind: input, shape index: {}]   ;;  %s636_s4 = inlined_call_operand.vmem [shape: f32[1,128], index: 4, kind: input, shape index: {}]   ;;  %s637_s5 = inlined_call_operand.hbm [shape: f32[1,1,8], index: 5, kind: output, shape index: {}]  }
   0x1   :  { %11 = vsyncpa [#allocation6], 0 }
   0x2   :  { %12 = vsyncpa [#allocation9], 0  ;;  %s29_s20 = sshll.u32 %s633_s1, 4  ;;  %s30_s20 = int_to_ptr.hbm [resolvable:$true] %s29_s20 }
   0x3   :  { %13 = vsyncpa [#allocation4], 0  ;;  %s575_s21 = smov [#allocation5]   ;;  %s19_s25 = sshll.u32 %s632_s0, 4  ;;  %s20_s25 = int_to_ptr.hbm [resolvable:$true] %s19_s25 }
   0x4   :  { %s31_s22 = sshll.u32 %s575_s21, 4  ;;  %s576_s26 = smov 128   ;;  %s32_s22 = int_to_ptr.vmem [resolvable:$true] %s31_s22 }
   0x5   :  { %s577_s27 = smov 8   ;;  %s578_s28 = smov [#allocation2]  }
   0x6   :  { %37 = dma.hbm_to_vmem [thread:$0]  %s30_s20, 512, %s32_s22, [#allocation6], %s576_s26, %s576_s26, %s577_s27  }
   0x7   :  { %s21_s29 = sshll.u32 %s578_s28, 4  ;;  %s43_s7 = sshll.u32 %s634_s2, 4  ;;  %s22_s29 = int_to_ptr.vmem [resolvable:$true] %s21_s29  ;;  %s44_s7 = int_to_ptr.hbm [resolvable:$true] %s43_s7 }
   0x8   :  { %24 = dma.hbm_to_vmem [thread:$0]  %s20_s25, 128, %s22_s29, [#allocation3]  }
   0x9   :  { %s53_s9 = sshll.u32 %s635_s3, 4  ;;  %s579_s10 = smov [#allocation7]   ;;  %s54_s9 = int_to_ptr.hbm [resolvable:$true] %s53_s9 }
   0xa   :  { %s45_s11 = sshll.u32 %s579_s10, 4  ;;  %s580_s0 = smov [#allocation8]   ;;  %s46_s11 = int_to_ptr.vmem [resolvable:$true] %s45_s11 }
   0xb   :  { %48 = dma.hbm_to_vmem [thread:$0]  %s44_s7, 32, %s46_s11, [#allocation6]  }
   0xc   :  { %s55_s12 = sshll.u32 %s580_s0, 4  ;;  %s581_s13 = smov 64   ;;  %s56_s12 = int_to_ptr.vmem [resolvable:$true] %s55_s12 }
   0xd   :  { %s582_s14 = smov 4  }
   0xe   :  { %61 = dma.hbm_to_vmem [thread:$0]  %s54_s9, 2048, %s56_s12, [#allocation9], %s581_s13, %s581_s13, %s582_s14  }
   0xf   :  { %567 = dma.done.wait [#allocation3], 128  }
  0x10   :  { %568 = vsyncadd [#allocation3], 4294967168 }
  0x11   :  { %569 = dma.done.wait [#allocation6], 544  }
  0x12   :  { %570 = vsyncadd [#allocation6], 4294966752 }
  0x13   :  { %571 = dma.done.wait [#allocation9], 2048  }
  0x14   :  { %572 = vsyncadd [#allocation9], 4294965248  ;;  %v345_v0 = vld [vmem:[#allocation5 + $0x10] sm:$0xf]  ;;  %v420_v1 = vld [vmem:[#allocation5 + $0x14] sm:$0xf0]  ;;  %v310_v51 = vlaneseq }
  0x15   :  { %v419_v2 = vld [vmem:[#allocation5 + $0x14] sm:$0xf]  ;;  %v346_v3 = vor.u32 %v420_v1, %v345_v0  ;;  %v347_v4 = vld [vmem:[#allocation5 + $0x18] sm:$0xf0]  ;;  %v337_v5 = vld [vmem:[#allocation5] sm:$0xf] }
  0x16   :  { %v418_v6 = vld [vmem:[#allocation5 + $0x4] sm:$0xf0]  ;;  %v350_v7 = vor.u32 %v419_v2, %v347_v4  ;;  %v417_v8 = vld [vmem:[#allocation5 + $0x4] sm:$0xf]  ;;  %v339_v9 = vld [vmem:[#allocation5 + $0x8] sm:$0xf0] }
  0x17   :  { %123 = vmatpush.bf16.msra.mxu0 %v346_v3  ;;  %v338_v10 = vor.u32 %v418_v6, %v337_v5  ;;  %v81_v11 = vld [vmem:[#allocation2] sm:$0xff]  ;;  %v342_v14 = vor.u32 %v417_v8, %v339_v9  ;;  %vm113_vm0 = vcmask 261120   ;;  %v426_v18 = vld [vmem:[#allocation8 + $0x28] sm:$0xff]  ;;  %v425_v20 = vld [vmem:[#allocation8 + $0x20] sm:$0xff]  ;;  %v311_v52 = vand.u32 127, %v310_v51  ;;  %s583_s15 = smov [#allocation10]  }
  0x18   :  { %v428_v12 = vld [vmem:[#allocation8 + $0x38] sm:$0xff]  ;;  %136 = vmatpush.bf16.msra.mxu1 %v350_v7  ;;  %v427_v15 = vld [vmem:[#allocation8 + $0x30] sm:$0xff]  ;;  %v82_v17 = vpack.c.bf16 %v81_v11, %v81_v11  ;;  %v434_v19 = vld [vmem:[#allocation8 + $0x68] sm:$0xff]  ;;  %s321_s16 = sshll.u32 %s583_s15, 4  ;;  %s323_s19 = sshll.u32 %s637_s5, 4  ;;  %vm314_vm1 = vcmask 57344   ;;  %s322_s16 = int_to_ptr.vmem [resolvable:$true] %s321_s16  ;;  %s324_s19 = int_to_ptr.hbm [resolvable:$true] %s323_s19 }
  0x19   :  { %v436_v13 = vld [vmem:[#allocation8 + $0x78] sm:$0xff]  ;;  %275 = vmatpush.bf16.msra.mxu2 %v428_v12  ;;  %v435_v16 = vld [vmem:[#allocation8 + $0x70] sm:$0xff]  ;;  %v433_v21 = vld [vmem:[#allocation8 + $0x60] sm:$0xff] }
  0x1a   :  { %288 = vmatpush.bf16.msra.mxu3 %v436_v13  ;;  %v424_v22 = vld [vmem:[#allocation8 + $0x18] sm:$0xff]  ;;  %v423_v24 = vld [vmem:[#allocation8 + $0x10] sm:$0xff]  ;;  %v422_v26 = vld [vmem:[#allocation8 + $0x8] sm:$0xff] }
  0x1b   :  { %124 = vmatpush.bf16.msra.mxu0 %v338_v10  ;;  %v432_v23 = vld [vmem:[#allocation8 + $0x58] sm:$0xff]  ;;  %v431_v25 = vld [vmem:[#allocation8 + $0x50] sm:$0xff]  ;;  %v430_v27 = vld [vmem:[#allocation8 + $0x48] sm:$0xff] }
  0x1c   :  { %137 = vmatpush.bf16.msra.mxu1 %v342_v14  ;;  %v421_v28 = vld [vmem:[#allocation8] sm:$0xff]  ;;  %v87_v30 = vld [vmem:[#allocation7] sm:$0x3]  ;;  %v446_v46 = vld [vmem:[%s636_s4] ss:$0 sm:$0xff] }
  0x1d   :  { %276 = vmatpush.bf16.msra.mxu2 %v427_v15  ;;  %v429_v29 = vld [vmem:[#allocation8 + $0x40] sm:$0xff]  ;;  %v89_v31 = vperm.slane %v87_v30, 0  ;;  %v90_v32 = vperm.slane %v87_v30, 1 }
  0x1e   :  { %289 = vmatpush.bf16.msra.mxu3 %v435_v16  ;;  %351 = vmatmul.msk.bf16.vlgmr.msra.gmra.mxu0 %vm113_vm0, %v82_v17 }
  0x1f   :  { %352 = vmatmul.msk.bf16.vlgmr.msra.gmra.mxu1 %vm113_vm0, %v82_v17 }
  0x21   :  { %277 = vmatpush.bf16.msra.mxu2 %v426_v18 }
  0x22   :  { %290 = vmatpush.bf16.msra.mxu3 %v434_v19 }
  0x25   :  { %278 = vmatpush.bf16.msra.mxu2 %v425_v20 }
  0x26   :  { %291 = vmatpush.bf16.msra.mxu3 %v433_v21 }
  0x29   :  { %279 = vmatpush.bf16.msra.mxu2 %v424_v22 }
  0x2a   :  { %292 = vmatpush.bf16.msra.mxu3 %v432_v23 }
  0x2d   :  { %280 = vmatpush.bf16.msra.mxu2 %v423_v24 }
  0x2e   :  { %293 = vmatpush.bf16.msra.mxu3 %v431_v25 }
  0x31   :  { %281 = vmatpush.bf16.msra.mxu2 %v422_v26 }
  0x32   :  { %294 = vmatpush.bf16.msra.mxu3 %v430_v27 }
  0x35   :  { %282 = vmatpush.bf16.msra.mxu2 %v421_v28 }
  0x36   :  { %295 = vmatpush.bf16.msra.mxu3 %v429_v29 }
  0x9b   :  { %v126_v33 = vpop.f32.mrf.mxu0 }
  0x9c   :  { %v127_v34 = vadd.f32 %v126_v33, %v89_v31  ;;  %v139_v35 = vpop.f32.mrf.mxu1 }
  0x9d   :  { %v140_v36 = vadd.f32 %v139_v35, %v90_v32 }
  0x9e   :  { %v143_v37 = vmax.f32 %v127_v34, 0.0 }
  0x9f   :  { %v144_v38 = vmax.f32 %v140_v36, 0.0 }
  0xa0   :  { %v145_v39 = vpack.c.bf16 %v143_v37, %v143_v37 }
  0xa1   :  { %v146_v40 = vpack.c.bf16 %v144_v38, %v144_v38 }
  0xa2   :  { %283 = vmatmul.bf16.vlgmr.msra.gmra.mxu2 %v145_v39 }
  0xa3   :  { %296 = vmatmul.bf16.vlgmr.msra.gmra.mxu3 %v146_v40  ;;  %v128_v41 = vpop.f32.mrf.mxu0 }
  0xa4   :  { %v141_v42 = vpop.f32.mrf.mxu1 }
 0x125   :  { %v284_v43 = vpop.f32.mrf.mxu2 }
 0x126   :  { %v297_v44 = vpop.f32.mrf.mxu3 }
 0x127   :  { %v298_v45 = vadd.f32 %v297_v44, %v284_v43 }
 0x129   :  { %v301_v47 = vmax.f32 %v298_v45, 0.0 }
 0x12b   :  { %v306_v48 = vmul.f32 %v446_v46, %v301_v47 }
 0x12d   :  { %307 = vadd.xlane.f32.xlu0 %v306_v48  ;;  %v286_v49 = vpop.f32.mrf.mxu2 }
 0x12e   :  { %v299_v50 = vpop.f32.mrf.mxu3 }
 0x1a0   :  { %v308_v53 = vpop.xlane.xlu0 %307 }
 0x1a1   :  { %v312_v54 = vperm.slane %v308_v53, %v311_v52 }
 0x1a3   :  { %315 = vst.msk [vmem:[#allocation10] sm:$0x1] %vm314_vm1, %v312_v54 }
 0x1a4   :  { %326 = dma.vmem_to_hbm [thread:$0]  %s322_s16, 16, %s324_s19, [#allocation4]  }
 0x1a5   :  { %573 = dma.done.wait [#allocation4], 16  }
 0x1a6   :  { %574 = vsyncadd [#allocation4], 4294967280 }
 0x1a7   :  { %331 = vsyncpa [#allocation3], 1 }
 0x1a8   :  { %332 = vsyncpa [#allocation6], 1 }
 0x1a9   :  { %333 = vsyncpa [#allocation9], 1 }
 0x1aa   :  { %334 = vsyncpa [#allocation4], 1 }

</bundles_post_ra>
